<compile_context>
chip_gen: v5e
topology: v5e:2x2
jax: 0.10.0
libtpu: 0.0.40
codegen_flags: <defaults>
</compile_context>

<pallas_src>
import jax
import jax.numpy as jnp
import numpy as np
from jax import lax
from jax.experimental import pallas as pl
from jax.experimental.pallas import tpu as pltpu

EPS = 1e-5

# MXU operand dtype.  bf16 operands + f32 accumulation is the recommended
# setting on v5e/v6e/v7x (f32 operands are multi-pass on the MXU).  Flip to
# jnp.float32 only for bit-tight comparison against an f32 reference.
MATMUL_DTYPE = jnp.bfloat16


def _make_kernel(Wo, N, Cp):
    """Kernel closure over the static output geometry; layout is (C, N)."""
    offsets = [(dh, dw) for dh in (-1, 0, 1) for dw in (-1, 0, 1)]
    inv_n = 1.0 / N

    def kernel(p1_ref, amask_ref, tmask_ref, wc_ref, w2_ref, par_ref, o_ref):
        # p1_ref    : (9*Cin, N)    bf16  im2col patches for the stride-2 conv1
        # amask_ref : (1, N)        f32   lane-dense active mask (1 - mask)
        # tmask_ref : (9, N)        f32   per-tap validity masks for conv2
        # wc_ref    : (2*Cp, 9*Cin) bf16  conv1 weights stacked over the
        #                                 zero-padded 1x1 shortcut weights
        # w2_ref    : (9, Cp, Cp)   bf16  conv2 weights, [tap, cout, cin]
        # par_ref   : (Cp, 16)      f32   packed per-channel params
        #                                 cols: b1 g1 be1 b2 g2 be2 bs gs bes
        # o_ref     : (Cp, N)       f32   lane-dense output
        amask = amask_ref[...]
        par = par_ref[...]
        b1, g1, be1 = par[:, 0:1], par[:, 1:2], par[:, 2:3]
        b2, g2, be2 = par[:, 3:4], par[:, 4:5], par[:, 5:6]
        bs, gs, bes = par[:, 6:7], par[:, 7:8], par[:, 8:9]

        def bn_mask(t, g, be):
            # training-mode BN (batch stats, biased variance) as a fused
            # per-channel affine; single pass over t (sum + sumsq).
            s1 = jnp.sum(t, axis=1, keepdims=True) * inv_n
            s2 = jnp.sum(t * t, axis=1, keepdims=True) * inv_n
            var = s2 - s1 * s1
            sc = g * lax.rsqrt(var + EPS)
            sh = be - s1 * sc
            return (t * sc + sh) * amask

        # ---- conv1 + 1x1 stride-2 shortcut: ONE MXU matmul ----
        res = jnp.dot(wc_ref[...], p1_ref[...],
                      preferred_element_type=jnp.float32)          # (2*Cp, N)
        a1 = (res[:Cp, :] + b1) * amask
        a1 = jnp.maximum(bn_mask(a1, g1, be1), 0.0)                # conv1+BN1+relu
        ident = (res[Cp:, :] + bs) * amask
        ident = bn_mask(ident, gs, bes)                            # shortcut+BN

        # ---- conv2 (3x3, stride 1, pad 1): 9 accumulated per-tap matmuls.
        #      Each tap is an XLU lane-rotate of a1; the roll's wrap-around
        #      columns are exactly the positions the precomputed validity
        #      mask zeroes, so correctness is preserved. ----
        acc = None
        for k, (dh, dw) in enumerate(offsets):
            off = dh * Wo + dw
            if off == 0:
                tap = a1
            else:
                tap = (pltpu.roll(a1, shift=(-off) % N, axis=1)
                       * tmask_ref[k:k + 1, :])
            part = jnp.dot(w2_ref[k], tap.astype(MATMUL_DTYPE),
                           preferred_element_type=jnp.float32)     # (Cp, N)
            acc = part if acc is None else acc + part

        out = bn_mask((acc + b2) * amask, g2, be2)
        o_ref[...] = jnp.maximum(out + ident, 0.0)                 # (Cp, N)

    return kernel


def resblock_down_sparse_forward(x_nchw, mask, params):
    """x_nchw: (B, Cin, H, W) float32 ; mask: (B, f, f) of {0,1}."""
    x = jnp.transpose(x_nchw, (0, 2, 3, 1)).astype(jnp.float32)     # NCHW -> NHWC
    B, H, W, Cin = x.shape
    Cout = params["w1"].shape[-1]
    f = mask.shape[1]
    assert H % 2 == 0 and W % 2 == 0
    Ho, Wo = H // 2, W // 2                 # 3x3 / stride 2 / pad 1 output size
    assert Ho % f == 0 and Wo % f == 0
    N = B * Ho * Wo
    Cp = ((Cout + 7) // 8) * 8              # sublane-aligned channel count

    # lane-dense active mask at the output resolution: (1, N)
    active = 1.0 - mask.astype(jnp.float32)
    active = jnp.repeat(active, Ho // f, axis=1)
    active = jnp.repeat(active, Wo // f, axis=2)                    # (B, Ho, Wo)
    amask = active.reshape(1, N)

    # per-tap validity masks for conv2's rolled taps (built host-side; the
    # kernel does 9 multiplies instead of iota/mod/compare/select chains)
    ho = np.arange(Ho)[:, None]
    wo = np.arange(Wo)[None, :]
    tlist = []
    for dh in (-1, 0, 1):
        for dw in (-1, 0, 1):
            v = ((ho + dh >= 0) & (ho + dh < Ho) &
                 (wo + dw >= 0) & (wo + dw < Wo)).astype(np.float32)
            tlist.append(np.broadcast_to(v, (B, Ho, Wo)).reshape(N))
    tmask = jnp.asarray(np.stack(tlist, axis=0))                    # (9, N)

    # im2col for the stride-2 conv1, built directly in the MXU operand dtype
    # (bf16 halves the dominant HBM<->VMEM traffic for this matrix).
    # TODO(synk): for production N, build the patches in-kernel from a
    # (Cin, B*H*W) input (strided rolls) to remove this HBM materialization.
    xb = x.astype(MATMUL_DTYPE)
    xpad = jnp.pad(xb, ((0, 0), (1, 1), (1, 1), (0, 0)))
    patches = [xpad[:, kh:kh + 2 * Ho:2, kw:kw + 2 * Wo:2, :]       # (B,Ho,Wo,Cin)
               for kh in range(3) for kw in range(3)]
    p1 = jnp.transpose(jnp.stack(patches, 0), (0, 4, 1, 2, 3)).reshape(9 * Cin, N)

    # conv1 weight (Cout, 9*Cin) stacked over the 1x1 shortcut weight placed
    # at the centre-tap columns -> conv1 + shortcut share one matmul and the
    # separate stride-2 shortcut input is dropped entirely.
    w1r = jnp.transpose(params["w1"].reshape(9 * Cin, Cout))        # (Cout, 9*Cin)
    wsr = jnp.transpose(params["ws"])                               # (Cout, Cin)
    wc = jnp.zeros((2 * Cp, 9 * Cin), jnp.float32)
    wc = wc.at[:Cout, :].set(w1r)
    wc = wc.at[Cp:Cp + Cout, 4 * Cin:5 * Cin].set(wsr)
    wc = wc.astype(MATMUL_DTYPE)

    # conv2 weights as (9, Cp, Cp), [tap, cout, cin]
    w2t = jnp.transpose(params["w2"], (0, 2, 1))                    # (9, Cout, Cout)
    w2p = jnp.zeros((9, Cp, Cp), jnp.float32).at[:, :Cout, :Cout].set(w2t)
    w2p = w2p.astype(MATMUL_DTYPE)

    # all per-channel vectors packed into a single (Cp, 16) array (one DMA)
    def colpad(p):
        return jnp.zeros((Cp,), jnp.float32).at[:Cout].set(
            p.reshape(Cout).astype(jnp.float32))
    names = ("b1", "g1", "be1", "b2", "g2", "be2", "bs", "gs", "bes")
    par = jnp.stack([colpad(params[n]) for n in names], axis=1)     # (Cp, 9)
    par = jnp.pad(par, ((0, 0), (0, 16 - len(names))))              # (Cp, 16)

    # TODO(synk): at production B*Ho*Wo, add an N-tiled grid (tile >= 512,
    # "arbitrary" N axis) with two-phase BN + row halo; size the tile off
    # pltpu.get_tpu_info().vmem_capacity_bytes (v7x: 64 MiB, half of v5e/v6e).
    # At these shapes the whole problem is a single VMEM-resident block.
    vmem = pl.BlockSpec(memory_space=pltpu.MemorySpace.VMEM)
    out = pl.pallas_call(
        _make_kernel(Wo, N, Cp),
        out_shape=jax.ShapeDtypeStruct((Cp, N), jnp.float32),
        in_specs=[vmem] * 6,
        out_specs=vmem,
        compiler_params=pltpu.CompilerParams(vmem_limit_bytes=32 * 1024 * 1024),
    )(p1, amask, tmask, wc, w2p, par)

    # (Cp, B*Ho*Wo) -> drop channel padding -> NCHW
    return jnp.transpose(out[:Cout].reshape(Cout, B, Ho, Wo), (1, 0, 2, 3))


# ---------------- pure-JAX reference (f32, for verification) ----------------
def ref_forward(x_nchw, mask, params):
    x = jnp.transpose(x_nchw, (0, 2, 3, 1)).astype(jnp.float32)
    B, H, W, Cin = x.shape
    Cout = params["w1"].shape[-1]
    f = mask.shape[1]
    Ho, Wo = H // 2, W // 2
    active = 1.0 - mask.astype(jnp.float32)
    active = jnp.repeat(active, Ho // f, axis=1)
    active = jnp.repeat(active, Wo // f, axis=2)[..., None]         # (B,Ho,Wo,1)
    hp = lax.Precision.HIGHEST

    def conv3(inp, w, b, stride):
        return lax.conv_general_dilated(
            inp, w.reshape(3, 3, inp.shape[-1], Cout), (stride, stride),
            [(1, 1), (1, 1)],
            dimension_numbers=("NHWC", "HWIO", "NHWC"),
            precision=hp) + b.reshape(Cout)

    def bn(inp, g, bt):
        mean = jnp.mean(inp, axis=(0, 1, 2))
        var = jnp.mean((inp - mean) ** 2, axis=(0, 1, 2))
        return (inp - mean) * lax.rsqrt(var + EPS) * g.reshape(Cout) + bt.reshape(Cout)

    out = conv3(x, params["w1"], params["b1"], 2) * active
    out = bn(out, params["g1"], params["be1"]) * active
    out = jax.nn.relu(out)
    out = conv3(out, params["w2"], params["b2"], 1) * active
    out = bn(out, params["g2"], params["be2"]) * active

    xs = x[:, ::2, ::2, :]
    ident = (jnp.einsum("bhwc,cd->bhwd", xs, params["ws"], precision=hp)
             + params["bs"].reshape(Cout)) * active
    ident = bn(ident, params["gs"], params["bes"]) * active
    return jnp.transpose(jax.nn.relu(out + ident), (0, 3, 1, 2))


if __name__ == "__main__":
    B, Cin, Cout, H, W, f = 2, 4, 8, 16, 16, 4

    key = jax.random.PRNGKey(0)
    keys = jax.random.split(key, 16)

    x = jax.random.normal(keys[0], (B, Cin, H, W), jnp.float32)
    mask = (jax.random.uniform(keys[1], (B, f, f)) > 0.5).astype(jnp.float32)

    params = {
        "w1": 0.1 * jax.random.normal(keys[2], (9, Cin, Cout), jnp.float32),
        "b1": 0.1 * jax.random.normal(keys[3], (1, Cout), jnp.float32),
        "g1": 1.0 + 0.1 * jax.random.normal(keys[4], (1, Cout), jnp.float32),
        "be1": 0.1 * jax.random.normal(keys[5], (1, Cout), jnp.float32),
        "w2": 0.1 * jax.random.normal(keys[6], (9, Cout, Cout), jnp.float32),
        "b2": 0.1 * jax.random.normal(keys[7], (1, Cout), jnp.float32),
        "g2": 1.0 + 0.1 * jax.random.normal(keys[8], (1, Cout), jnp.float32),
        "be2": 0.1 * jax.random.normal(keys[9], (1, Cout), jnp.float32),
        "ws": 0.1 * jax.random.normal(keys[10], (Cin, Cout), jnp.float32),
        "bs": 0.1 * jax.random.normal(keys[11], (1, Cout), jnp.float32),
        "gs": 1.0 + 0.1 * jax.random.normal(keys[12], (1, Cout), jnp.float32),
        "bes": 0.1 * jax.random.normal(keys[13], (1, Cout), jnp.float32),
    }

    out = jax.block_until_ready(resblock_down_sparse_forward(x, mask, params))
    ref = ref_forward(x, mask, params)
    # bf16 MXU operands (f32 accumulation) vs. the f32 reference need a looser
    # tolerance; flip MATMUL_DTYPE to f32 for a 2e-3 check.
    tol = 2e-3 if MATMUL_DTYPE == jnp.float32 else 5e-2
    np.testing.assert_allclose(np.asarray(out), np.asarray(ref), rtol=tol, atol=tol)
    print("KERNEL_OK")
</pallas_src>

<mosaic_0001>
module attributes {stable_mosaic.version = 11 : i64} {
  func.func @kernel(%arg0: memref<36x128xbf16, #tpu.memory_space<vmem>>, %arg1: memref<1x128xf32, #tpu.memory_space<vmem>>, %arg2: memref<9x128xf32, #tpu.memory_space<vmem>>, %arg3: memref<16x36xbf16, #tpu.memory_space<vmem>>, %arg4: memref<9x8x8xbf16, #tpu.memory_space<vmem>>, %arg5: memref<8x16xf32, #tpu.memory_space<vmem>>, %arg6: memref<8x128xf32, #tpu.memory_space<vmem>>) attributes {dimension_semantics = [], scalar_prefetch = 0 : i64, scratch_operands = 0 : i64, tpu.core_type = #tpu.core_type<tc>} {
    %c0 = arith.constant 0 : index
    %c0_0 = arith.constant 0 : index
    %0 = vector.load %arg1[%c0, %c0_0] : memref<1x128xf32, #tpu.memory_space<vmem>>, vector<1x128xf32>
    %c0_1 = arith.constant 0 : index
    %c0_2 = arith.constant 0 : index
    %1 = vector.load %arg5[%c0_1, %c0_2] : memref<8x16xf32, #tpu.memory_space<vmem>>, vector<8x16xf32>
    %2 = vector.extract_strided_slice %1 {offsets = [0, 0], sizes = [8, 1], strides = [1, 1]} : vector<8x16xf32> to vector<8x1xf32>
    %3 = vector.extract_strided_slice %1 {offsets = [0, 1], sizes = [8, 1], strides = [1, 1]} : vector<8x16xf32> to vector<8x1xf32>
    %4 = vector.extract_strided_slice %1 {offsets = [0, 2], sizes = [8, 1], strides = [1, 1]} : vector<8x16xf32> to vector<8x1xf32>
    %5 = vector.extract_strided_slice %1 {offsets = [0, 3], sizes = [8, 1], strides = [1, 1]} : vector<8x16xf32> to vector<8x1xf32>
    %6 = vector.extract_strided_slice %1 {offsets = [0, 4], sizes = [8, 1], strides = [1, 1]} : vector<8x16xf32> to vector<8x1xf32>
    %7 = vector.extract_strided_slice %1 {offsets = [0, 5], sizes = [8, 1], strides = [1, 1]} : vector<8x16xf32> to vector<8x1xf32>
    %8 = vector.extract_strided_slice %1 {offsets = [0, 6], sizes = [8, 1], strides = [1, 1]} : vector<8x16xf32> to vector<8x1xf32>
    %9 = vector.extract_strided_slice %1 {offsets = [0, 7], sizes = [8, 1], strides = [1, 1]} : vector<8x16xf32> to vector<8x1xf32>
    %10 = vector.extract_strided_slice %1 {offsets = [0, 8], sizes = [8, 1], strides = [1, 1]} : vector<8x16xf32> to vector<8x1xf32>
    %c0_3 = arith.constant 0 : index
    %c0_4 = arith.constant 0 : index
    %11 = vector.load %arg3[%c0_3, %c0_4] : memref<16x36xbf16, #tpu.memory_space<vmem>>, vector<16x36xbf16>
    %c0_5 = arith.constant 0 : index
    %c0_6 = arith.constant 0 : index
    %12 = vector.load %arg0[%c0_5, %c0_6] : memref<36x128xbf16, #tpu.memory_space<vmem>>, vector<36x128xbf16>
    %cst = arith.constant dense<0.000000e+00> : vector<16x128xf32>
    %13 = tpu.matmul %11, %12, %cst {dimension_numbers = #tpu.dot_dimension_numbers<[1], [0], [0], [1], [0, 0, 1, 1], [], []>} : vector<16x36xbf16>, vector<36x128xbf16>, vector<16x128xf32> -> vector<16x128xf32>
    %14 = vector.extract_strided_slice %13 {offsets = [0, 0], sizes = [8, 128], strides = [1, 1]} : vector<16x128xf32> to vector<8x128xf32>
    %15 = vector.broadcast %2 : vector<8x1xf32> to vector<8x128xf32>
    %16 = arith.addf %14, %15 : vector<8x128xf32>
    %17 = vector.broadcast %0 : vector<1x128xf32> to vector<8x128xf32>
    %18 = arith.mulf %16, %17 : vector<8x128xf32>
    %cst_7 = arith.constant dense<0.000000e+00> : vector<8xf32>
    %19 = vector.multi_reduction <add>, %18, %cst_7 [1] : vector<8x128xf32> to vector<8xf32>
    %20 = vector.shape_cast %19 : vector<8xf32> to vector<8x1xf32>
    %cst_8 = arith.constant 7.812500e-03 : f32
    %21 = vector.broadcast %cst_8 : f32 to vector<8x1xf32>
    %22 = arith.mulf %20, %21 : vector<8x1xf32>
    %23 = arith.mulf %18, %18 : vector<8x128xf32>
    %cst_9 = arith.constant dense<0.000000e+00> : vector<8xf32>
    %24 = vector.multi_reduction <add>, %23, %cst_9 [1] : vector<8x128xf32> to vector<8xf32>
    %25 = vector.shape_cast %24 : vector<8xf32> to vector<8x1xf32>
    %cst_10 = arith.constant 7.812500e-03 : f32
    %26 = vector.broadcast %cst_10 : f32 to vector<8x1xf32>
    %27 = arith.mulf %25, %26 : vector<8x1xf32>
    %28 = arith.mulf %22, %22 : vector<8x1xf32>
    %29 = arith.subf %27, %28 : vector<8x1xf32>
    %cst_11 = arith.constant 9.99999974E-6 : f32
    %30 = vector.broadcast %cst_11 : f32 to vector<8x1xf32>
    %31 = arith.addf %29, %30 : vector<8x1xf32>
    %32 = math.rsqrt %31 : vector<8x1xf32>
    %33 = arith.mulf %3, %32 : vector<8x1xf32>
    %34 = arith.mulf %22, %33 : vector<8x1xf32>
    %35 = arith.subf %4, %34 : vector<8x1xf32>
    %36 = vector.broadcast %33 : vector<8x1xf32> to vector<8x128xf32>
    %37 = arith.mulf %18, %36 : vector<8x128xf32>
    %38 = vector.broadcast %35 : vector<8x1xf32> to vector<8x128xf32>
    %39 = arith.addf %37, %38 : vector<8x128xf32>
    %40 = vector.broadcast %0 : vector<1x128xf32> to vector<8x128xf32>
    %41 = arith.mulf %39, %40 : vector<8x128xf32>
    %cst_12 = arith.constant 0.000000e+00 : f32
    %42 = vector.broadcast %cst_12 : f32 to vector<8x128xf32>
    %43 = arith.maximumf %41, %42 : vector<8x128xf32>
    %44 = vector.extract_strided_slice %13 {offsets = [8, 0], sizes = [8, 128], strides = [1, 1]} : vector<16x128xf32> to vector<8x128xf32>
    %45 = vector.broadcast %8 : vector<8x1xf32> to vector<8x128xf32>
    %46 = arith.addf %44, %45 : vector<8x128xf32>
    %47 = vector.broadcast %0 : vector<1x128xf32> to vector<8x128xf32>
    %48 = arith.mulf %46, %47 : vector<8x128xf32>
    %cst_13 = arith.constant dense<0.000000e+00> : vector<8xf32>
    %49 = vector.multi_reduction <add>, %48, %cst_13 [1] : vector<8x128xf32> to vector<8xf32>
    %50 = vector.shape_cast %49 : vector<8xf32> to vector<8x1xf32>
    %cst_14 = arith.constant 7.812500e-03 : f32
    %51 = vector.broadcast %cst_14 : f32 to vector<8x1xf32>
    %52 = arith.mulf %50, %51 : vector<8x1xf32>
    %53 = arith.mulf %48, %48 : vector<8x128xf32>
    %cst_15 = arith.constant dense<0.000000e+00> : vector<8xf32>
    %54 = vector.multi_reduction <add>, %53, %cst_15 [1] : vector<8x128xf32> to vector<8xf32>
    %55 = vector.shape_cast %54 : vector<8xf32> to vector<8x1xf32>
    %cst_16 = arith.constant 7.812500e-03 : f32
    %56 = vector.broadcast %cst_16 : f32 to vector<8x1xf32>
    %57 = arith.mulf %55, %56 : vector<8x1xf32>
    %58 = arith.mulf %52, %52 : vector<8x1xf32>
    %59 = arith.subf %57, %58 : vector<8x1xf32>
    %cst_17 = arith.constant 9.99999974E-6 : f32
    %60 = vector.broadcast %cst_17 : f32 to vector<8x1xf32>
    %61 = arith.addf %59, %60 : vector<8x1xf32>
    %62 = math.rsqrt %61 : vector<8x1xf32>
    %63 = arith.mulf %9, %62 : vector<8x1xf32>
    %64 = arith.mulf %52, %63 : vector<8x1xf32>
    %65 = arith.subf %10, %64 : vector<8x1xf32>
    %66 = vector.broadcast %63 : vector<8x1xf32> to vector<8x128xf32>
    %67 = arith.mulf %48, %66 : vector<8x128xf32>
    %68 = vector.broadcast %65 : vector<8x1xf32> to vector<8x128xf32>
    %69 = arith.addf %67, %68 : vector<8x128xf32>
    %70 = vector.broadcast %0 : vector<1x128xf32> to vector<8x128xf32>
    %71 = arith.mulf %69, %70 : vector<8x128xf32>
    %c9_i32 = arith.constant 9 : i32
    %72 = tpu.dynamic_rotate %43 by %c9_i32 dim 1 : vector<8x128xf32>, i32 -> vector<8x128xf32>
    %c0_18 = arith.constant 0 : index
    %c0_19 = arith.constant 0 : index
    %73 = vector.load %arg2[%c0_18, %c0_19] : memref<9x128xf32, #tpu.memory_space<vmem>>, vector<1x128xf32>
    %74 = vector.broadcast %73 : vector<1x128xf32> to vector<8x128xf32>
    %75 = arith.mulf %72, %74 : vector<8x128xf32>
    %c0_20 = arith.constant 0 : index
    %c0_21 = arith.constant 0 : index
    %c0_22 = arith.constant 0 : index
    %76 = vector.load %arg4[%c0_20, %c0_21, %c0_22] : memref<9x8x8xbf16, #tpu.memory_space<vmem>>, vector<1x8x8xbf16>
    %77 = vector.shape_cast %76 : vector<1x8x8xbf16> to vector<8x8xbf16>
    %78 = arith.truncf %75 : vector<8x128xf32> to vector<8x128xbf16>
    %cst_23 = arith.constant dense<0.000000e+00> : vector<8x128xf32>
    %79 = tpu.matmul %77, %78, %cst_23 {dimension_numbers = #tpu.dot_dimension_numbers<[1], [0], [0], [1], [0, 0, 1, 1], [], []>} : vector<8x8xbf16>, vector<8x128xbf16>, vector<8x128xf32> -> vector<8x128xf32>
    %c8_i32 = arith.constant 8 : i32
    %80 = tpu.dynamic_rotate %43 by %c8_i32 dim 1 : vector<8x128xf32>, i32 -> vector<8x128xf32>
    %c1 = arith.constant 1 : index
    %c0_24 = arith.constant 0 : index
    %81 = vector.load %arg2[%c1, %c0_24] : memref<9x128xf32, #tpu.memory_space<vmem>>, vector<1x128xf32>
    %82 = vector.broadcast %81 : vector<1x128xf32> to vector<8x128xf32>
    %83 = arith.mulf %80, %82 : vector<8x128xf32>
    %c1_25 = arith.constant 1 : index
    %c0_26 = arith.constant 0 : index
    %c0_27 = arith.constant 0 : index
    %84 = vector.load %arg4[%c1_25, %c0_26, %c0_27] : memref<9x8x8xbf16, #tpu.memory_space<vmem>>, vector<1x8x8xbf16>
    %85 = vector.shape_cast %84 : vector<1x8x8xbf16> to vector<8x8xbf16>
    %86 = arith.truncf %83 : vector<8x128xf32> to vector<8x128xbf16>
    %cst_28 = arith.constant dense<0.000000e+00> : vector<8x128xf32>
    %87 = tpu.matmul %85, %86, %cst_28 {dimension_numbers = #tpu.dot_dimension_numbers<[1], [0], [0], [1], [0, 0, 1, 1], [], []>} : vector<8x8xbf16>, vector<8x128xbf16>, vector<8x128xf32> -> vector<8x128xf32>
    %88 = arith.addf %79, %87 : vector<8x128xf32>
    %c7_i32 = arith.constant 7 : i32
    %89 = tpu.dynamic_rotate %43 by %c7_i32 dim 1 : vector<8x128xf32>, i32 -> vector<8x128xf32>
    %c2 = arith.constant 2 : index
    %c0_29 = arith.constant 0 : index
    %90 = vector.load %arg2[%c2, %c0_29] : memref<9x128xf32, #tpu.memory_space<vmem>>, vector<1x128xf32>
    %91 = vector.broadcast %90 : vector<1x128xf32> to vector<8x128xf32>
    %92 = arith.mulf %89, %91 : vector<8x128xf32>
    %c2_30 = arith.constant 2 : index
    %c0_31 = arith.constant 0 : index
    %c0_32 = arith.constant 0 : index
    %93 = vector.load %arg4[%c2_30, %c0_31, %c0_32] : memref<9x8x8xbf16, #tpu.memory_space<vmem>>, vector<1x8x8xbf16>
    %94 = vector.shape_cast %93 : vector<1x8x8xbf16> to vector<8x8xbf16>
    %95 = arith.truncf %92 : vector<8x128xf32> to vector<8x128xbf16>
    %cst_33 = arith.constant dense<0.000000e+00> : vector<8x128xf32>
    %96 = tpu.matmul %94, %95, %cst_33 {dimension_numbers = #tpu.dot_dimension_numbers<[1], [0], [0], [1], [0, 0, 1, 1], [], []>} : vector<8x8xbf16>, vector<8x128xbf16>, vector<8x128xf32> -> vector<8x128xf32>
    %97 = arith.addf %88, %96 : vector<8x128xf32>
    %c1_i32 = arith.constant 1 : i32
    %98 = tpu.dynamic_rotate %43 by %c1_i32 dim 1 : vector<8x128xf32>, i32 -> vector<8x128xf32>
    %c3 = arith.constant 3 : index
    %c0_34 = arith.constant 0 : index
    %99 = vector.load %arg2[%c3, %c0_34] : memref<9x128xf32, #tpu.memory_space<vmem>>, vector<1x128xf32>
    %100 = vector.broadcast %99 : vector<1x128xf32> to vector<8x128xf32>
    %101 = arith.mulf %98, %100 : vector<8x128xf32>
    %c3_35 = arith.constant 3 : index
    %c0_36 = arith.constant 0 : index
    %c0_37 = arith.constant 0 : index
    %102 = vector.load %arg4[%c3_35, %c0_36, %c0_37] : memref<9x8x8xbf16, #tpu.memory_space<vmem>>, vector<1x8x8xbf16>
    %103 = vector.shape_cast %102 : vector<1x8x8xbf16> to vector<8x8xbf16>
    %104 = arith.truncf %101 : vector<8x128xf32> to vector<8x128xbf16>
    %cst_38 = arith.constant dense<0.000000e+00> : vector<8x128xf32>
    %105 = tpu.matmul %103, %104, %cst_38 {dimension_numbers = #tpu.dot_dimension_numbers<[1], [0], [0], [1], [0, 0, 1, 1], [], []>} : vector<8x8xbf16>, vector<8x128xbf16>, vector<8x128xf32> -> vector<8x128xf32>
    %106 = arith.addf %97, %105 : vector<8x128xf32>
    %c4 = arith.constant 4 : index
    %c0_39 = arith.constant 0 : index
    %c0_40 = arith.constant 0 : index
    %107 = vector.load %arg4[%c4, %c0_39, %c0_40] : memref<9x8x8xbf16, #tpu.memory_space<vmem>>, vector<1x8x8xbf16>
    %108 = vector.shape_cast %107 : vector<1x8x8xbf16> to vector<8x8xbf16>
    %109 = arith.truncf %43 : vector<8x128xf32> to vector<8x128xbf16>
    %cst_41 = arith.constant dense<0.000000e+00> : vector<8x128xf32>
    %110 = tpu.matmul %108, %109, %cst_41 {dimension_numbers = #tpu.dot_dimension_numbers<[1], [0], [0], [1], [0, 0, 1, 1], [], []>} : vector<8x8xbf16>, vector<8x128xbf16>, vector<8x128xf32> -> vector<8x128xf32>
    %111 = arith.addf %106, %110 : vector<8x128xf32>
    %c127_i32 = arith.constant 127 : i32
    %112 = tpu.dynamic_rotate %43 by %c127_i32 dim 1 : vector<8x128xf32>, i32 -> vector<8x128xf32>
    %c5 = arith.constant 5 : index
    %c0_42 = arith.constant 0 : index
    %113 = vector.load %arg2[%c5, %c0_42] : memref<9x128xf32, #tpu.memory_space<vmem>>, vector<1x128xf32>
    %114 = vector.broadcast %113 : vector<1x128xf32> to vector<8x128xf32>
    %115 = arith.mulf %112, %114 : vector<8x128xf32>
    %c5_43 = arith.constant 5 : index
    %c0_44 = arith.constant 0 : index
    %c0_45 = arith.constant 0 : index
    %116 = vector.load %arg4[%c5_43, %c0_44, %c0_45] : memref<9x8x8xbf16, #tpu.memory_space<vmem>>, vector<1x8x8xbf16>
    %117 = vector.shape_cast %116 : vector<1x8x8xbf16> to vector<8x8xbf16>
    %118 = arith.truncf %115 : vector<8x128xf32> to vector<8x128xbf16>
    %cst_46 = arith.constant dense<0.000000e+00> : vector<8x128xf32>
    %119 = tpu.matmul %117, %118, %cst_46 {dimension_numbers = #tpu.dot_dimension_numbers<[1], [0], [0], [1], [0, 0, 1, 1], [], []>} : vector<8x8xbf16>, vector<8x128xbf16>, vector<8x128xf32> -> vector<8x128xf32>
    %120 = arith.addf %111, %119 : vector<8x128xf32>
    %c121_i32 = arith.constant 121 : i32
    %121 = tpu.dynamic_rotate %43 by %c121_i32 dim 1 : vector<8x128xf32>, i32 -> vector<8x128xf32>
    %c6 = arith.constant 6 : index
    %c0_47 = arith.constant 0 : index
    %122 = vector.load %arg2[%c6, %c0_47] : memref<9x128xf32, #tpu.memory_space<vmem>>, vector<1x128xf32>
    %123 = vector.broadcast %122 : vector<1x128xf32> to vector<8x128xf32>
    %124 = arith.mulf %121, %123 : vector<8x128xf32>
    %c6_48 = arith.constant 6 : index
    %c0_49 = arith.constant 0 : index
    %c0_50 = arith.constant 0 : index
    %125 = vector.load %arg4[%c6_48, %c0_49, %c0_50] : memref<9x8x8xbf16, #tpu.memory_space<vmem>>, vector<1x8x8xbf16>
    %126 = vector.shape_cast %125 : vector<1x8x8xbf16> to vector<8x8xbf16>
    %127 = arith.truncf %124 : vector<8x128xf32> to vector<8x128xbf16>
    %cst_51 = arith.constant dense<0.000000e+00> : vector<8x128xf32>
    %128 = tpu.matmul %126, %127, %cst_51 {dimension_numbers = #tpu.dot_dimension_numbers<[1], [0], [0], [1], [0, 0, 1, 1], [], []>} : vector<8x8xbf16>, vector<8x128xbf16>, vector<8x128xf32> -> vector<8x128xf32>
    %129 = arith.addf %120, %128 : vector<8x128xf32>
    %c120_i32 = arith.constant 120 : i32
    %130 = tpu.dynamic_rotate %43 by %c120_i32 dim 1 : vector<8x128xf32>, i32 -> vector<8x128xf32>
    %c7 = arith.constant 7 : index
    %c0_52 = arith.constant 0 : index
    %131 = vector.load %arg2[%c7, %c0_52] : memref<9x128xf32, #tpu.memory_space<vmem>>, vector<1x128xf32>
    %132 = vector.broadcast %131 : vector<1x128xf32> to vector<8x128xf32>
    %133 = arith.mulf %130, %132 : vector<8x128xf32>
    %c7_53 = arith.constant 7 : index
    %c0_54 = arith.constant 0 : index
    %c0_55 = arith.constant 0 : index
    %134 = vector.load %arg4[%c7_53, %c0_54, %c0_55] : memref<9x8x8xbf16, #tpu.memory_space<vmem>>, vector<1x8x8xbf16>
    %135 = vector.shape_cast %134 : vector<1x8x8xbf16> to vector<8x8xbf16>
    %136 = arith.truncf %133 : vector<8x128xf32> to vector<8x128xbf16>
    %cst_56 = arith.constant dense<0.000000e+00> : vector<8x128xf32>
    %137 = tpu.matmul %135, %136, %cst_56 {dimension_numbers = #tpu.dot_dimension_numbers<[1], [0], [0], [1], [0, 0, 1, 1], [], []>} : vector<8x8xbf16>, vector<8x128xbf16>, vector<8x128xf32> -> vector<8x128xf32>
    %138 = arith.addf %129, %137 : vector<8x128xf32>
    %c119_i32 = arith.constant 119 : i32
    %139 = tpu.dynamic_rotate %43 by %c119_i32 dim 1 : vector<8x128xf32>, i32 -> vector<8x128xf32>
    %c8 = arith.constant 8 : index
    %c0_57 = arith.constant 0 : index
    %140 = vector.load %arg2[%c8, %c0_57] : memref<9x128xf32, #tpu.memory_space<vmem>>, vector<1x128xf32>
    %141 = vector.broadcast %140 : vector<1x128xf32> to vector<8x128xf32>
    %142 = arith.mulf %139, %141 : vector<8x128xf32>
    %c8_58 = arith.constant 8 : index
    %c0_59 = arith.constant 0 : index
    %c0_60 = arith.constant 0 : index
    %143 = vector.load %arg4[%c8_58, %c0_59, %c0_60] : memref<9x8x8xbf16, #tpu.memory_space<vmem>>, vector<1x8x8xbf16>
    %144 = vector.shape_cast %143 : vector<1x8x8xbf16> to vector<8x8xbf16>
    %145 = arith.truncf %142 : vector<8x128xf32> to vector<8x128xbf16>
    %cst_61 = arith.constant dense<0.000000e+00> : vector<8x128xf32>
    %146 = tpu.matmul %144, %145, %cst_61 {dimension_numbers = #tpu.dot_dimension_numbers<[1], [0], [0], [1], [0, 0, 1, 1], [], []>} : vector<8x8xbf16>, vector<8x128xbf16>, vector<8x128xf32> -> vector<8x128xf32>
    %147 = arith.addf %138, %146 : vector<8x128xf32>
    %148 = vector.broadcast %5 : vector<8x1xf32> to vector<8x128xf32>
    %149 = arith.addf %147, %148 : vector<8x128xf32>
    %150 = vector.broadcast %0 : vector<1x128xf32> to vector<8x128xf32>
    %151 = arith.mulf %149, %150 : vector<8x128xf32>
    %cst_62 = arith.constant dense<0.000000e+00> : vector<8xf32>
    %152 = vector.multi_reduction <add>, %151, %cst_62 [1] : vector<8x128xf32> to vector<8xf32>
    %153 = vector.shape_cast %152 : vector<8xf32> to vector<8x1xf32>
    %cst_63 = arith.constant 7.812500e-03 : f32
    %154 = vector.broadcast %cst_63 : f32 to vector<8x1xf32>
    %155 = arith.mulf %153, %154 : vector<8x1xf32>
    %156 = arith.mulf %151, %151 : vector<8x128xf32>
    %cst_64 = arith.constant dense<0.000000e+00> : vector<8xf32>
    %157 = vector.multi_reduction <add>, %156, %cst_64 [1] : vector<8x128xf32> to vector<8xf32>
    %158 = vector.shape_cast %157 : vector<8xf32> to vector<8x1xf32>
    %cst_65 = arith.constant 7.812500e-03 : f32
    %159 = vector.broadcast %cst_65 : f32 to vector<8x1xf32>
    %160 = arith.mulf %158, %159 : vector<8x1xf32>
    %161 = arith.mulf %155, %155 : vector<8x1xf32>
    %162 = arith.subf %160, %161 : vector<8x1xf32>
    %cst_66 = arith.constant 9.99999974E-6 : f32
    %163 = vector.broadcast %cst_66 : f32 to vector<8x1xf32>
    %164 = arith.addf %162, %163 : vector<8x1xf32>
    %165 = math.rsqrt %164 : vector<8x1xf32>
    %166 = arith.mulf %6, %165 : vector<8x1xf32>
    %167 = arith.mulf %155, %166 : vector<8x1xf32>
    %168 = arith.subf %7, %167 : vector<8x1xf32>
    %169 = vector.broadcast %166 : vector<8x1xf32> to vector<8x128xf32>
    %170 = arith.mulf %151, %169 : vector<8x128xf32>
    %171 = vector.broadcast %168 : vector<8x1xf32> to vector<8x128xf32>
    %172 = arith.addf %170, %171 : vector<8x128xf32>
    %173 = vector.broadcast %0 : vector<1x128xf32> to vector<8x128xf32>
    %174 = arith.mulf %172, %173 : vector<8x128xf32>
    %175 = arith.addf %174, %71 : vector<8x128xf32>
    %cst_67 = arith.constant 0.000000e+00 : f32
    %176 = vector.broadcast %cst_67 : f32 to vector<8x128xf32>
    %177 = arith.maximumf %175, %176 : vector<8x128xf32>
    %c0_68 = arith.constant 0 : index
    %c0_69 = arith.constant 0 : index
    %178 = vector.load %arg6[%c0_68, %c0_69] : memref<8x128xf32, #tpu.memory_space<vmem>>, vector<8x128xf32>
    tpu.vector_store %arg6[%c0_68, %c0_69], %177 {strides = array<i32>} : memref<8x128xf32, #tpu.memory_space<vmem>>, vector<8x128xf32>,
    return
  }
}

</mosaic_0001>

<bundles_post_ra>
// kernel: tpu_custom_call.1
= control target key start
LH: loop header
LB: loop body
LE: loop exit
PB: predicated region body
PF: predicated region fallthrough
CT: control target
= control target key end

     0   :  { %vm58_vm0 = vcmask 1041408   ;;  %v586_v3 = vmov 0   ;;  %s758_s0 = inlined_call_operand.vmem [shape: bf16[36,128], index: 0, kind: input, shape index: {}]   ;;  %s759_s1 = inlined_call_operand.vmem [shape: f32[1,128], index: 1, kind: input, shape index: {}]   ;;  %s760_s2 = inlined_call_operand.vmem [shape: f32[9,128], index: 2, kind: input, shape index: {}]   ;;  %s761_s3 = inlined_call_operand.vmem [shape: bf16[16,36], index: 3, kind: input, shape index: {}]   ;;  %s762_s4 = inlined_call_operand.vmem [shape: bf16[9,8,8], index: 4, kind: input, shape index: {}]   ;;  %s763_s5 = inlined_call_operand.vmem [shape: f32[8,16], index: 5, kind: input, shape index: {}]   ;;  %s764_s6 = inlined_call_operand.hbm [shape: f32[8,128], index: 6, kind: output, shape index: {}]  }
   0x1   :  { %v33_v0 = vld [vmem:[%s758_s0 + $0x10] sm:$0x3]  ;;  %v645_v2 = vld [vmem:[%s763_s5] sm:$0xff]  ;;  %535 = vset.pattern.permute.xlu0 %v586_v3 }
   0x2   :  { %v48_v1 = vunpack.c.l.b16 %v33_v0  ;;  %78 = vperm.xlu0 %535, %v645_v2  }
   0x4   :  { %v51_v4 = vpack.c.b16 %v48_v1, %v48_v1 }
   0x5   :  { %11 = vsyncpa [#allocation3], 0  ;;  %v516_v6 = vld [vmem:[%s758_s0 + $0x8] sm:$0xff]  ;;  %v515_v7 = vld [vmem:[%s758_s0] sm:$0xff]  ;;  %vm54_vm1 = vcmask 293888   ;;  %v587_v9 = vmov 6  }
   0x6   :  { %v60_v5 = vsel %vm58_vm0, %v51_v4, 0  ;;  %v514_v8 = vld [vmem:[%s761_s3] sm:$0xff]  ;;  %v588_v16 = vmov 1   ;;  %s589_s0 = smov 1   ;;  %v590_v38 = vmov 2   ;;  %s592_s3 = smov 119  }
   0x7   :  { %67 = vmatpush.bf16.msra.mxu0 %v60_v5  ;;  %v660_v11 = vld [vmem:[%s759_s1] ss:$0 sm:$0xff]  ;;  %536 = vset.pattern.permute.xlu2 %v588_v16  ;;  %s591_s1 = smov 9   ;;  %s593_s8 = smov 8   ;;  %vm192_vm5 = vcmask 1043456   ;;  %vm188_vm6 = vcmask 64512  }
   0x8   :  { %s594_s9 = smov 120   ;;  %s595_s10 = smov 7   ;;  %v546_v47 = vld [vmem:[%s760_s2] ss:$0 sm:$0xff]  ;;  %v547_v53 = vld [vmem:[%s760_s2 + $0x1] ss:$0 sm:$0xff] }
   0x9   :  { %s596_s11 = smov 127   ;;  %s597_s12 = smov 121   ;;  %v178_v55 = vld [vmem:[%s762_s4] sm:$0xf]  ;;  %v497_v61 = vld [vmem:[%s762_s4 + $0x4] sm:$0xf] }
   0xa   :  { %538 = vset.pattern.permute.xlu0 %v587_v9  ;;  %v548_v60 = vld [vmem:[%s760_s2 + $0x2] ss:$0 sm:$0xff]  ;;  %v549_v3 = vld [vmem:[%s760_s2 + $0x3] ss:$0 sm:$0xff]  ;;  %v550_v4 = vld [vmem:[%s760_s2 + $0x5] ss:$0 sm:$0xff] }
   0xb   :  { %68 = vmatpush.bf16.msra.mxu0 %v516_v6  ;;  %v500_v5 = vld [vmem:[%s762_s4 + $0x8] sm:$0xf]  ;;  %v504_v6 = vld [vmem:[%s762_s4 + $0x10] sm:$0xf]  ;;  %s475_s21 = sshll.u32 %s764_s6, 4  ;;  %s476_s21 = int_to_ptr.hbm [resolvable:$true] %s475_s21 }
   0xc   :  { %v551_v16 = vld [vmem:[%s760_s2 + $0x8] ss:$0 sm:$0xff] }
   0xf   :  { %69 = vmatpush.bf16.msra.mxu0 %v515_v7 }
  0x12   :  { %496 = vmatmul.msk.bf16.vlgmr.msra.gmra.mxu0 %vm54_vm1, %v514_v8 }
  0x74   :  { %v79_v10 = vpop.permute.xlu0 %78 }
  0x8f   :  { %v71_v12 = vpop.f32.mrf.mxu0 }
  0x90   :  { %v81_v13 = vadd.f32 %v79_v10, %v71_v12 }
  0x92   :  { %v85_v14 = vmul.f32 %v660_v11, %v81_v13 }
  0x94   :  { %86 = vadd.xlane.f32.xlu0 %v85_v14  ;;  %v89_v15 = vmul.f32 %v85_v14, %v85_v14 }
  0x96   :  { %90 = vadd.xlane.f32.xlu1 %v89_v15 }
  0x97   :  { %v73_v27 = vpop.f32.mrf.mxu0 }
  0xa8   :  { %128 = vperm.xlu0 %538, %v645_v2  }
 0x107   :  { %v87_v17 = vpop.xlane.xlu0 %86 }
 0x108   :  { %v88_v18 = vmul.f32 0.0078125, %v87_v17  ;;  %v552_v17 = vld [vmem:[%s760_s2 + $0x6] ss:$0 sm:$0xff] }
 0x109   :  { %v91_v19 = vpop.xlane.xlu1 %90 }
 0x10a   :  { %v93_v20 = vmul.f32 %v88_v18, %v88_v18  ;;  %v92_v21 = vmul.f32 0.0078125, %v91_v19 }
 0x10c   :  { %v94_v22 = vsub.f32 %v92_v21, %v93_v20 }
 0x10e   :  { %v95_v23 = vadd.f32 1e-05, %v94_v22 }
 0x110   :  { %554 = vrsqrt.f32 %v95_v23  ;;  %vm102_vm3 = vweird.f32 %v95_v23 }
 0x116   :  { %v555_v24 = vpop.eup %554 }
 0x117   :  { %v97_v25 = vmul.f32 %v555_v24, %v95_v23  ;;  %vm103_vm2 = vweird.f32 %v555_v24 }
 0x118   :  { %vm104_vm4 = vmor %vm102_vm3, %vm103_vm2 }
 0x119   :  { %v98_v26 = vmul.f32 %v555_v24, %v97_v25 }
 0x11a   :  { %v129_v28 = vpop.permute.xlu0 %128 }
 0x11b   :  { %v131_v29 = vadd.f32 %v129_v28, %v73_v27  ;;  %v99_v30 = vmul.f32 0.5, %v98_v26  ;;  %v553_v27 = vld [vmem:[%s760_s2 + $0x7] ss:$0 sm:$0xff]  ;;  %v506_v28 = vld [vmem:[%s762_s4 + $0x14] sm:$0xf] }
 0x11d   :  { %v665_v31 = vmul.f32 %v660_v11, %v131_v29  ;;  %v100_v32 = vsub.f32 1.5, %v99_v30  ;;  %v512_v29 = vld [vmem:[%s762_s4 + $0x20] sm:$0xf]  ;;  %v508_v30 = vld [vmem:[%s762_s4 + $0x18] sm:$0xf] }
 0x11f   :  { %v136_v33 = vmul.f32 %v665_v31, %v665_v31  ;;  %v101_v34 = vmul.f32 %v555_v24, %v100_v32 }
 0x121   :  { %137 = vadd.xlane.f32.xlu0 %v136_v33  ;;  %v105_v35 = vsel %vm104_vm4, %v555_v24, %v101_v34 }
 0x122   :  { %v106_v36 = vmul.f32 %v105_v35, %v645_v2 }
 0x124   :  { %115 = vperm.xlu2 %536, %v106_v36   ;;  %v107_v37 = vmul.f32 %v106_v36, %v88_v18  ;;  %v502_v18 = vld [vmem:[%s762_s4 + $0xc] sm:$0xf]  ;;  %v510_v36 = vld [vmem:[%s762_s4 + $0x1c] sm:$0xf]  ;;  %s603_s4 = smov [#allocation2]  }
 0x126   :  { %109 = vrot.lane.b32.xlu1 %v107_v37, %s589_s0  ;;  %v598_v37 = vmov 3  }
 0x12c   :  { %537 = vset.pattern.permute.xlu2 %v590_v38 }
 0x17e   :  { %v116_v41 = vpop.permute.xlu2 %115 }
 0x17f   :  { %v118_v42 = vmul.f32 %v116_v41, %v85_v14 }
 0x198   :  { %v110_v39 = vpop.permute.xlu1 %109 }
 0x199   :  { %v112_v40 = vsub.f32 %v645_v2, %v110_v39 }
 0x19b   :  { %121 = vperm.xlu2 %537, %v112_v40  }
 0x1a3   :  { %539 = vset.pattern.permute.xlu2 %v598_v37 }
 0x1f5   :  { %v122_v43 = vpop.permute.xlu2 %121 }
 0x1f6   :  { %v124_v44 = vadd.f32 %v122_v43, %v118_v42 }
 0x1f8   :  { %v125_v45 = vmul.f32 %v660_v11, %v124_v44 }
 0x1fa   :  { %v126_v46 = vmax.f32 %v125_v45, 0.0 }
 0x1fc   :  { %256 = vrot.lane.b32.xlu1 %v126_v46, %s589_s0  ;;  %173 = vrot.lane.b32.xlu2 %v126_v46, %s591_s1  ;;  %v286_v50 = vpack.c.bf16 %v126_v46, %v126_v46 }
 0x1fe   :  { %v291_v54 = vsel %vm192_vm5, %v286_v50, 0 }
 0x204   :  { %391 = vrot.lane.b32.xlu1 %v126_v46, %s592_s3  ;;  %180 = vrot.lane.b32.xlu2 %v126_v46, %s593_s8 }
 0x20c   :  { %363 = vrot.lane.b32.xlu1 %v126_v46, %s594_s9  ;;  %228 = vrot.lane.b32.xlu2 %v126_v46, %s595_s10 }
 0x214   :  { %307 = vrot.lane.b32.xlu2 %v126_v46, %s596_s11 }
 0x21c   :  { %335 = vrot.lane.b32.xlu2 %v126_v46, %s597_s12  ;;  %v138_v46 = vpop.xlane.xlu0 %137 }
 0x224   :  { %420 = vperm.xlu2 %539, %v645_v2  }
 0x236   :  { %133 = vadd.xlane.f32.xlu1 %v665_v31 }
 0x256   :  { %v174_v48 = vpop.permute.xlu2 %173 }
 0x257   :  { %v177_v49 = vmul.f32 %v546_v47, %v174_v48 }
 0x259   :  { %v179_v51 = vpack.c.bf16 %v177_v49, %v177_v49  ;;  %v139_v49 = vmul.f32 0.0078125, %v138_v46 }
 0x25b   :  { %v213_v52 = vsel %vm192_vm5, %v179_v51, 0 }
 0x25c   :  { %222 = vmatpush.bf16.msra.mxu2 %v213_v52 }
 0x25e   :  { %v181_v56 = vpop.permute.xlu2 %180 }
 0x25f   :  { %v184_v57 = vmul.f32 %v547_v53, %v181_v56  ;;  %499 = vmatmul.msk.bf16.vlgmr.msra.gmra.mxu2 %vm188_vm6, %v178_v55 }
 0x260   :  { %300 = vmatpush.bf16.msrb.mxu2 %v291_v54 }
 0x261   :  { %v187_v58 = vpack.c.bf16 %v184_v57, %v184_v57 }
 0x263   :  { %v194_v59 = vsel %vm192_vm5, %v187_v58, 0 }
 0x264   :  { %203 = vmatpush.bf16.msra.mxu1 %v194_v59 }
 0x266   :  { %v229_v62 = vpop.permute.xlu2 %228 }
 0x267   :  { %v232_v63 = vmul.f32 %v548_v60, %v229_v62  ;;  %498 = vmatmul.msk.bf16.vlgmr.msra.gmra.mxu1 %vm188_vm6, %v497_v61 }
 0x269   :  { %v235_v0 = vpack.c.bf16 %v232_v63, %v232_v63 }
 0x26b   :  { %v240_v1 = vsel %vm192_vm5, %v235_v0, 0 }
 0x26c   :  { %249 = vmatpush.bf16.msra.mxu3 %v240_v1 }
 0x26e   :  { %v257_v7 = vpop.permute.xlu1 %256  ;;  %v308_v8 = vpop.permute.xlu2 %307 }
 0x26f   :  { %v260_v9 = vmul.f32 %v549_v3, %v257_v7  ;;  %v311_v10 = vmul.f32 %v550_v4, %v308_v8  ;;  %501 = vmatmul.msk.bf16.vlgmr.msra.gmra.mxu3 %vm188_vm6, %v500_v5  ;;  %505 = vmatmul.msk.bf16.vlgmr.msrb.gmra.mxu2 %vm188_vm6, %v504_v6  ;;  %v599_v6 = vmov 7  }
 0x270   :  { %540 = vset.pattern.permute.xlu2 %v599_v6 }
 0x271   :  { %v263_v12 = vpack.c.bf16 %v260_v9, %v260_v9  ;;  %v314_v13 = vpack.c.bf16 %v311_v10, %v311_v10 }
 0x273   :  { %v268_v14 = vsel %vm192_vm5, %v263_v12, 0  ;;  %v319_v15 = vsel %vm192_vm5, %v314_v13, 0 }
 0x274   :  { %277 = vmatpush.bf16.msrb.mxu1 %v268_v14  ;;  %328 = vmatpush.bf16.msrb.mxu3 %v319_v15 }
 0x276   :  { %v392_v19 = vpop.permute.xlu1 %391  ;;  %v336_v20 = vpop.permute.xlu2 %335 }
 0x277   :  { %v395_v21 = vmul.f32 %v551_v16, %v392_v19  ;;  %v339_v22 = vmul.f32 %v552_v17, %v336_v20  ;;  %503 = vmatmul.msk.bf16.vlgmr.msrb.gmra.mxu1 %vm188_vm6, %v502_v18 }
 0x279   :  { %v398_v23 = vpack.c.bf16 %v395_v21, %v395_v21  ;;  %v342_v24 = vpack.c.bf16 %v339_v22, %v339_v22 }
 0x27b   :  { %v403_v25 = vsel %vm192_vm5, %v398_v23, 0  ;;  %v347_v26 = vsel %vm192_vm5, %v342_v24, 0  ;;  %v600_v23 = vmov 4  }
 0x27c   :  { %356 = vmatpush.bf16.msrb.mxu0 %v347_v26  ;;  %412 = vmatpush.bf16.msra.mxu2 %v403_v25  ;;  %v601_v25 = vmov 8  }
 0x27d   :  { %541 = vset.pattern.permute.xlu0 %v600_v23  ;;  %542 = vset.pattern.permute.xlu1 %v601_v25 }
 0x27e   :  { %v364_v32 = vpop.permute.xlu1 %363  ;;  %v421_v5 = vpop.permute.xlu2 %420 }
 0x27f   :  { %v367_v33 = vmul.f32 %v553_v27, %v364_v32  ;;  %507 = vmatmul.msk.bf16.vlgmr.msrb.gmra.mxu3 %vm188_vm6, %v506_v28  ;;  %513 = vmatmul.msk.bf16.vlgmr.msra.gmra.mxu2 %vm188_vm6, %v512_v29 }
 0x280   :  { %509 = vmatmul.msk.bf16.vlgmr.msrb.gmra.mxu0 %vm188_vm6, %v508_v30 }
 0x281   :  { %v370_v34 = vpack.c.bf16 %v367_v33, %v367_v33 }
 0x283   :  { %v375_v35 = vsel %vm192_vm5, %v370_v34, 0 }
 0x284   :  { %384 = vmatpush.bf16.msra.mxu1 %v375_v35 }
 0x287   :  { %511 = vmatmul.msk.bf16.vlgmr.msra.gmra.mxu1 %vm188_vm6, %v510_v36 }
 0x2a9   :  { %v134_v42 = vpop.xlane.xlu1 %133 }
 0x2aa   :  { %v135_v43 = vmul.f32 0.0078125, %v134_v42 }
 0x2ac   :  { %v140_v48 = vmul.f32 %v135_v43, %v135_v43 }
 0x2ae   :  { %v141_v51 = vsub.f32 %v139_v49, %v140_v48 }
 0x2b0   :  { %v142_v56 = vadd.f32 1e-05, %v141_v51 }
 0x2b2   :  { %556 = vrsqrt.f32 %v142_v56  ;;  %vm149_vm8 = vweird.f32 %v142_v56 }
 0x2b8   :  { %v557_v3 = vpop.eup %556 }
 0x2b9   :  { %v144_v8 = vmul.f32 %v557_v3, %v142_v56  ;;  %vm150_vm7 = vweird.f32 %v557_v3 }
 0x2ba   :  { %vm151_vm9 = vmor %vm149_vm8, %vm150_vm7 }
 0x2bb   :  { %v145_v15 = vmul.f32 %v557_v3, %v144_v8 }
 0x2bd   :  { %v146_v17 = vmul.f32 0.5, %v145_v15 }
 0x2bf   :  { %v147_v18 = vsub.f32 1.5, %v146_v17 }
 0x2c1   :  { %v148_v19 = vmul.f32 %v557_v3, %v147_v18 }
 0x2c3   :  { %v152_v20 = vsel %vm151_vm9, %v557_v3, %v148_v19 }
 0x2c4   :  { %v153_v21 = vmul.f32 %v152_v20, %v645_v2 }
 0x2c6   :  { %v154_v22 = vmul.f32 %v153_v21, %v135_v43 }
 0x2e2   :  { %v224_v38 = vpop.f32.mrf.mxu2 }
 0x2e4   :  { %v205_v39 = vpop.f32.mrf.mxu1 }
 0x2e5   :  { %v225_v50 = vadd.f32 %v224_v38, %v205_v39 }
 0x2ea   :  { %v226_v40 = vpop.f32.mrf.mxu2 }
 0x2ec   :  { %v207_v41 = vpop.f32.mrf.mxu1 }
 0x2f2   :  { %v251_v44 = vpop.f32.mrf.mxu3  ;;  %v302_v45 = vpop.f32.mrf.mxu2 }
 0x2f3   :  { %v255_v52 = vadd.f32 %v251_v44, %v225_v50  ;;  %v602_v44 = vmov 5  }
 0x2f4   :  { %v279_v47 = vpop.f32.mrf.mxu1 }
 0x2f5   :  { %v283_v57 = vadd.f32 %v279_v47, %v255_v52 }
 0x2f7   :  { %v306_v59 = vadd.f32 %v302_v45, %v283_v57 }
 0x2fa   :  { %v253_v53 = vpop.f32.mrf.mxu3  ;;  %v304_v54 = vpop.f32.mrf.mxu2 }
 0x2fc   :  { %v281_v55 = vpop.f32.mrf.mxu1 }
 0x2fd   :  { %v358_v58 = vpop.f32.mrf.mxu0 }
 0x302   :  { %v330_v60 = vpop.f32.mrf.mxu3  ;;  %v414_v61 = vpop.f32.mrf.mxu2 }
 0x303   :  { %v334_v62 = vadd.f32 %v330_v60, %v306_v59 }
 0x304   :  { %v386_v63 = vpop.f32.mrf.mxu1 }
 0x305   :  { %v362_v0 = vadd.f32 %v358_v58, %v334_v62  ;;  %v360_v1 = vpop.f32.mrf.mxu0 }
 0x307   :  { %v390_v4 = vadd.f32 %v386_v63, %v362_v0 }
 0x309   :  { %v418_v7 = vadd.f32 %v414_v61, %v390_v4 }
 0x30a   :  { %v332_v9 = vpop.f32.mrf.mxu3  ;;  %v416_v10 = vpop.f32.mrf.mxu2 }
 0x30b   :  { %v423_v12 = vadd.f32 %v421_v5, %v418_v7 }
 0x30c   :  { %v388_v13 = vpop.f32.mrf.mxu1 }
 0x30d   :  { %v424_v14 = vmul.f32 %v660_v11, %v423_v12 }
 0x30f   :  { %425 = vadd.xlane.f32.xlu2 %v424_v14  ;;  %v428_v16 = vmul.f32 %v424_v14, %v424_v14 }
 0x311   :  { %429 = vadd.xlane.f32.xlu1 %v428_v16 }
 0x327   :  { %156 = vrot.lane.b32.xlu2 %v154_v22, %s589_s0 }
 0x32f   :  { %162 = vperm.xlu2 %540, %v153_v21  }
 0x337   :  { %543 = vset.pattern.permute.xlu2 %v602_v44 }
 0x382   :  { %v426_v24 = vpop.xlane.xlu2 %425 }
 0x383   :  { %v427_v26 = vmul.f32 0.0078125, %v426_v24 }
 0x384   :  { %v430_v27 = vpop.xlane.xlu1 %429 }
 0x385   :  { %v432_v28 = vmul.f32 %v427_v26, %v427_v26  ;;  %v431_v29 = vmul.f32 0.0078125, %v430_v27 }
 0x387   :  { %v433_v30 = vsub.f32 %v431_v29, %v432_v28 }
 0x389   :  { %v434_v32 = vadd.f32 1e-05, %v433_v30 }
 0x38a   :  { %v157_v42 = vpop.permute.xlu2 %156 }
 0x38b   :  { %558 = vrsqrt.f32 %v434_v32  ;;  %vm441_vm11 = vweird.f32 %v434_v32  ;;  %v159_v43 = vsub.f32 %v645_v2, %v157_v42 }
 0x391   :  { %v559_v33 = vpop.eup %558 }
 0x392   :  { %v436_v34 = vmul.f32 %v559_v33, %v434_v32  ;;  %vm442_vm10 = vweird.f32 %v559_v33  ;;  %v163_v47 = vpop.permute.xlu2 %162 }
 0x393   :  { %vm443_vm12 = vmor %vm441_vm11, %vm442_vm10  ;;  %v165_v50 = vmul.f32 %v163_v47, %v665_v31 }
 0x394   :  { %v437_v35 = vmul.f32 %v559_v33, %v436_v34 }
 0x396   :  { %v438_v36 = vmul.f32 0.5, %v437_v35 }
 0x398   :  { %v439_v37 = vsub.f32 1.5, %v438_v36 }
 0x39a   :  { %v440_v38 = vmul.f32 %v559_v33, %v439_v37 }
 0x39c   :  { %v444_v39 = vsel %vm443_vm12, %v559_v33, %v440_v38 }
 0x39d   :  { %v445_v40 = vmul.f32 %v444_v39, %v645_v2 }
 0x39f   :  { %454 = vperm.xlu0 %541, %v445_v40   ;;  %v446_v41 = vmul.f32 %v445_v40, %v427_v26 }
 0x3a1   :  { %448 = vrot.lane.b32.xlu1 %v446_v41, %s589_s0  ;;  %s473_s0 = sshll.u32 %s603_s4, 4  ;;  %s474_s0 = int_to_ptr.vmem [resolvable:$true] %s473_s0 }
 0x3a7   :  { %544 = vset.pattern.permute.xlu0 %v602_v44 }
 0x3a9   :  { %168 = vperm.xlu1 %542, %v159_v43  }
 0x411   :  { %v455_v48 = vpop.permute.xlu0 %454 }
 0x412   :  { %v457_v51 = vmul.f32 %v455_v48, %v424_v14 }
 0x413   :  { %v449_v45 = vpop.permute.xlu1 %448 }
 0x414   :  { %v451_v46 = vsub.f32 %v645_v2, %v449_v45 }
 0x416   :  { %460 = vperm.xlu2 %543, %v451_v46  }
 0x41b   :  { %v169_v49 = vpop.permute.xlu1 %168 }
 0x41c   :  { %v171_v52 = vadd.f32 %v169_v49, %v165_v50 }
 0x41e   :  { %v172_v55 = vmul.f32 %v660_v11, %v171_v52 }
 0x470   :  { %v461_v53 = vpop.permute.xlu2 %460 }
 0x471   :  { %v463_v54 = vadd.f32 %v461_v53, %v457_v51 }
 0x473   :  { %v464_v56 = vmul.f32 %v660_v11, %v463_v54 }
 0x475   :  { %v465_v2 = vadd.f32 %v464_v56, %v172_v55 }
 0x477   :  { %v466_v57 = vmax.f32 %v465_v2, 0.0 }
 0x479   :  { %467 = vst [vmem:[#allocation2] sm:$0xff] %v466_v57 }
 0x47a   :  { %478 = dma.vmem_to_hbm [thread:$0]  %s474_s0, 128, %s476_s21, [#allocation3]  }
 0x47b   :  { %584 = dma.done.wait [#allocation3], 128  }
 0x47c   :  { %585 = vsyncadd [#allocation3], 4294967168 }
 0x47d   :  { %483 = vsyncpa [#allocation3], 1 }

</bundles_post_ra>
